<compile_context>
chip_gen: v5e
topology: v5e:2x2
jax: 0.10.0
libtpu: 0.0.40
codegen_flags: <defaults>
</compile_context>

<pallas_src>
import functools
import math

import jax
import jax.numpy as jnp
from jax import lax
from jax.experimental import pallas as pl
from jax.experimental.pallas import tpu as pltpu


_NEG_INF = -1.0e9

# Single-buffer constant-index blocks when this jax version supports it.
try:
    _BUF1 = {"pipeline_mode": pl.Buffered(1)}
    pl.BlockSpec((8, 128), lambda b, s: (0, 0), **_BUF1)
except Exception:  # pragma: no cover — older jax without pipeline_mode kwarg
    _BUF1 = {}


@functools.lru_cache(maxsize=1)
def _vmem_limit_bytes():
    """Generation-aware VMEM request: physical capacity minus headroom."""
    cap = 128 * 1024 * 1024
    try:
        cap = int(getattr(pltpu.get_tpu_info(), "vmem_capacity_bytes", cap) or cap)
    except Exception:
        pass
    # Leave >=16 MiB for Mosaic internal scratch; never request > ~100 MiB.
    return int(max(32 * 1024 * 1024,
                   min(cap - 16 * 1024 * 1024, 100 * 1024 * 1024)))


def _layer_norm(x, g, b, eps=1e-5):
    # torch.nn.LayerNorm: biased variance over last dim, f32 math
    mu = jnp.mean(x, axis=-1, keepdims=True)
    var = jnp.mean((x - mu) ** 2, axis=-1, keepdims=True)
    return (x - mu) * lax.rsqrt(var + eps) * g + b


def _gelu_exact(x):
    # torch.nn.GELU default (approximate='none') = erf-based GELU
    return 0.5 * x * (1.0 + lax.erf(x * (1.0 / math.sqrt(2.0))))


# --------------------- kernel A: LN1 + fused QKV projection -----------------

def qkv_kernel(x_ref, g1_ref, b1_ref, wqkv_ref, q_ref, kt_ref, v_ref):
    x = x_ref[0]                                            # (ts, D) f32
    D = x.shape[-1]
    ln1 = _layer_norm(x, g1_ref[...], b1_ref[...])
    # Q columns of wqkv are pre-scaled by 1/sqrt(d_k) (folded in the wrapper).
    qkv = jnp.dot(ln1.astype(jnp.bfloat16), wqkv_ref[...],
                  preferred_element_type=jnp.float32)       # (ts, 3D) f32 acc
    q_ref[0] = qkv[:, 0 * D:1 * D].astype(jnp.bfloat16)
    # K is emitted pre-transposed -> kernel B's score matmul needs no XLU work.
    kt_ref[0] = qkv[:, 1 * D:2 * D].astype(jnp.bfloat16).T  # (D, ts)
    v_ref[0] = qkv[:, 2 * D:3 * D].astype(jnp.bfloat16)


# --------------- kernel B: attention + output projection + FFN --------------

def attn_ffn_kernel(mrow_ref, mcol_ref, x_ref, q_ref, kt_ref, v_ref,
                    wo_ref, g2_ref, b2_ref, w1_ref, bf1_ref, w2_ref, bf2_ref,
                    o_ref, ctx_ref, *, heads):
    x = x_ref[0]                      # (tq, D) f32
    q = q_ref[0]                      # (tq, D) bf16 (pre-scaled)
    kt = kt_ref[0]                    # (D,  S) bf16 (pre-transposed)
    v = v_ref[0]                      # (S,  D) bf16
    mrow = mrow_ref[0]                # (tq, 1) f32 : mask for query rows
    mcol = mcol_ref[0]                # (1,  S) f32 : mask for key columns

    tq, D = x.shape
    d_k = D // heads
    mask_zero = (mrow == 0.0) | (mcol == 0.0)               # (tq, S)

    # ---- input sublayer: x + MHA(LN1(x)) (LN1/QKV done in kernel A) -------
    # Per-head contexts are packed into a (tq, D) bf16 scratch so the output
    # projection is a single full-depth (tq, D) @ (D, D) MXU matmul.
    for h in range(heads):                                  # static unroll
        sl = slice(h * d_k, (h + 1) * d_k)
        scores = jnp.dot(q[:, sl], kt[sl, :],
                         preferred_element_type=jnp.float32)  # (tq, S)
        scores = jnp.where(mask_zero, _NEG_INF, scores)       # masked_fill(-1e9)
        smax = jnp.max(scores, axis=-1, keepdims=True)
        e = jnp.exp(scores - smax)
        p = e * pl.reciprocal(jnp.sum(e, axis=-1, keepdims=True), approx=True)
        p = jnp.where(mask_zero, 0.0, p)                     # masked_fill(0)
        ctx_ref[:, sl] = jnp.dot(p.astype(jnp.bfloat16), v[:, sl],
                                 preferred_element_type=jnp.float32
                                 ).astype(jnp.bfloat16)

    attn_out = jnp.dot(ctx_ref[...], wo_ref[...],
                       preferred_element_type=jnp.float32)   # (tq, D)
    x = x + attn_out

    # ---- output sublayer: x + FFN(LN2(x)) ----------------------------------
    ln2 = _layer_norm(x, g2_ref[...], b2_ref[...])
    h1 = jnp.dot(ln2.astype(jnp.bfloat16), w1_ref[...],
                 preferred_element_type=jnp.float32) + bf1_ref[...]
    h1 = _gelu_exact(h1)
    h2 = jnp.dot(h1.astype(jnp.bfloat16), w2_ref[...],
                 preferred_element_type=jnp.float32) + bf2_ref[...]

    # PositionwiseFeedForward mask: mask3.sum(-1) = mrow * sum(mcol)
    row_keep = (mrow * jnp.sum(mcol)) > 0.0                  # (tq, 1)
    h2 = jnp.where(row_keep, h2, 0.0)

    o_ref[0] = x + h2


# ------------------------------- wrappers ------------------------------------

def _const(shape):
    """Constant-index block (weights/biases): single-buffered if supported."""
    n = len(shape)
    return pl.BlockSpec(shape, lambda b, s: (0,) * n, **_BUF1)


def _choose_tiles(S):
    """Return (S_padded, ts, tq): lane/sublane-friendly padding + row tiles."""
    if S <= 256:
        Sp = max(8, ((S + 7) // 8) * 8)      # sublane-align small sequences
        return Sp, Sp, Sp
    Sp = pl.cdiv(S, 256) * 256               # lane-dense padding for long S
    ts = 512 if Sp % 512 == 0 else 256       # kernel A: bigger tile, tiny footprint
    tq = 256                                 # kernel B: match 256-wide MXU M dim
    return Sp, ts, tq


def transformer_block(x, mask_row, mask_col, p, heads, ts, tq):
    B, Sp, D = x.shape
    Dff = p["w1_t"].shape[1]
    vmem_limit = _vmem_limit_bytes()

    # ---- pass 1: LN1 + fused (pre-scaled) QKV projection, K pre-transposed --
    qkv_cost = pl.CostEstimate(
        flops=2 * B * Sp * D * 3 * D,
        transcendentals=0,
        bytes_accessed=4 * B * Sp * D + 2 * 3 * B * Sp * D + 2 * D * 3 * D)
    q, kt, v = pl.pallas_call(
        qkv_kernel,
        out_shape=(jax.ShapeDtypeStruct((B, Sp, D), jnp.bfloat16),
                   jax.ShapeDtypeStruct((B, D, Sp), jnp.bfloat16),
                   jax.ShapeDtypeStruct((B, Sp, D), jnp.bfloat16)),
        grid=(B, Sp // ts),
        in_specs=[
            pl.BlockSpec((1, ts, D), lambda b, s: (b, s, 0)),   # x rows
            _const((1, D)), _const((1, D)),                     # ln1 gamma/beta
            _const((D, 3 * D)),                                 # fused Wqkv
        ],
        out_specs=(pl.BlockSpec((1, ts, D), lambda b, s: (b, s, 0)),   # Q
                   pl.BlockSpec((1, D, ts), lambda b, s: (b, 0, s)),   # K^T
                   pl.BlockSpec((1, ts, D), lambda b, s: (b, s, 0))),  # V
        compiler_params=pltpu.CompilerParams(
            dimension_semantics=("parallel", "parallel"),
            vmem_limit_bytes=vmem_limit),
        cost_estimate=qkv_cost,
    )(x, p["ln1_g"], p["ln1_b"], p["wqkv_t"])

    # ---- pass 2: attention + output projection + LN2 + FFN ------------------
    attn_cost = pl.CostEstimate(
        flops=2 * B * Sp * (2 * Sp * D + D * D + 2 * D * Dff),
        transcendentals=B * Sp * (Sp + Dff),
        bytes_accessed=(2 * 4 * B * Sp * D + 3 * 2 * B * Sp * D
                        + 2 * (D * D + 2 * D * Dff)))
    kernel = functools.partial(attn_ffn_kernel, heads=heads)
    kv_spec_kwargs = dict(_BUF1)   # K/V index only changes with b: single-buffer
    return pl.pallas_call(
        kernel,
        out_shape=jax.ShapeDtypeStruct((B, Sp, D), jnp.float32),
        grid=(B, Sp // tq),
        in_specs=[
            pl.BlockSpec((1, tq, 1), lambda b, s: (b, s, 0)),   # mask (rows)
            pl.BlockSpec((1, 1, Sp), lambda b, s: (b, 0, 0)),   # mask (cols)
            pl.BlockSpec((1, tq, D), lambda b, s: (b, s, 0)),   # x tile
            pl.BlockSpec((1, tq, D), lambda b, s: (b, s, 0)),   # q tile
            pl.BlockSpec((1, D, Sp), lambda b, s: (b, 0, 0),    # K^T (full seq)
                         **kv_spec_kwargs),
            pl.BlockSpec((1, Sp, D), lambda b, s: (b, 0, 0),    # V   (full seq)
                         **kv_spec_kwargs),
            _const((D, D)),                                     # Wo (pre-T)
            _const((1, D)), _const((1, D)),                     # ln2 gamma/beta
            _const((D, Dff)), _const((1, Dff)),                 # ffn W1, b1
            _const((Dff, D)), _const((1, D)),                   # ffn W2, b2
        ],
        out_specs=pl.BlockSpec((1, tq, D), lambda b, s: (b, s, 0)),
        scratch_shapes=[pltpu.VMEM((tq, D), jnp.bfloat16)],     # packed ctx
        compiler_params=pltpu.CompilerParams(
            dimension_semantics=("parallel", "parallel"),
            vmem_limit_bytes=vmem_limit),
        cost_estimate=attn_cost,
    )(mask_row, mask_col, x, q, kt, v,
      p["wo_t"], p["ln2_g"], p["ln2_b"],
      p["w1_t"], p["b1"], p["w2_t"], p["b2"])


def transformer_layer_forward(x, mask, params, heads):
    """params: list (one dict per TransformerBlock, kernel layout).
    Returns (emb, cls_emb)."""
    B, S, D = x.shape
    if mask is None:
        mask = jnp.ones((B, S), dtype=jnp.float32)
    mask = mask.astype(jnp.float32)

    # Pad the sequence to a lane/sublane-friendly length; padded positions are
    # given mask==0, which reproduces masked semantics exactly (zeroed rows,
    # no attention to padded keys) and keeps every block lane-dense.
    Sp, ts, tq = _choose_tiles(S)
    if Sp != S:
        x = jnp.pad(x, ((0, 0), (0, Sp - S), (0, 0)))
        mask = jnp.pad(mask, ((0, 0), (0, Sp - S)))

    # The (B,S,S) einsum mask is never materialized: it factorizes as
    # mask[:, i] * mask[:, j]; pass row/col views instead.
    mask_row = mask.reshape(B, Sp, 1)
    mask_col = mask.reshape(B, 1, Sp)

    for p in params:
        x = transformer_block(x, mask_row, mask_col, p, heads, ts, tq)

    x = x[:, :S, :]
    emb = x
    cls_emb = x[:, 0, :]
    return emb, cls_emb


# ------------------------------ parameters ----------------------------------

def init_block_params(key, d_model):
    """Torch-layout parameters (Linear: y = x @ W.T)."""
    d_ff = 4 * d_model
    ks = jax.random.split(key, 8)
    s = 0.1
    return {
        "wq": s * jax.random.normal(ks[0], (d_model, d_model), jnp.float32),
        "wk": s * jax.random.normal(ks[1], (d_model, d_model), jnp.float32),
        "wv": s * jax.random.normal(ks[2], (d_model, d_model), jnp.float32),
        "wo": s * jax.random.normal(ks[3], (d_model, d_model), jnp.float32),
        "ln1_g": jnp.ones((1, d_model), jnp.float32),
        "ln1_b": jnp.zeros((1, d_model), jnp.float32),
        "w1": s * jax.random.normal(ks[4], (d_ff, d_model), jnp.float32),
        "b1": s * jax.random.normal(ks[5], (1, d_ff), jnp.float32),
        "w2": s * jax.random.normal(ks[6], (d_model, d_ff), jnp.float32),
        "b2": s * jax.random.normal(ks[7], (1, d_model), jnp.float32),
        "ln2_g": jnp.ones((1, d_model), jnp.float32),
        "ln2_b": jnp.zeros((1, d_model), jnp.float32),
    }


def prepare_block_params(raw, heads):
    """Torch layout -> kernel layout: pre-transposed, QKV fused (with the
    1/sqrt(d_k) scale folded into the Q columns in f32 before the bf16 cast),
    bf16 MXU operands; LayerNorm params and biases stay f32."""
    bf16 = jnp.bfloat16
    f32 = jnp.float32
    d_model = raw["wq"].shape[0]
    d_k = d_model // heads
    scale = 1.0 / math.sqrt(d_k)
    wqkv_t = jnp.concatenate(
        [raw["wq"].T * scale, raw["wk"].T, raw["wv"].T], axis=1).astype(bf16)
    return {
        "wqkv_t": wqkv_t,                      # (D, 3D)
        "wo_t": raw["wo"].T.astype(bf16),      # (D, D)
        "w1_t": raw["w1"].T.astype(bf16),      # (D, Dff)
        "w2_t": raw["w2"].T.astype(bf16),      # (Dff, D)
        "b1": raw["b1"].astype(f32),           # (1, Dff)
        "b2": raw["b2"].astype(f32),           # (1, D)
        "ln1_g": raw["ln1_g"].astype(f32), "ln1_b": raw["ln1_b"].astype(f32),
        "ln2_g": raw["ln2_g"].astype(f32), "ln2_b": raw["ln2_b"].astype(f32),
    }


if __name__ == "__main__":
    B, S, D = 2, 8, 32
    HEADS = 1          # TransformerLayer default heads=1
    NUM_LAYERS = 1     # TransformerLayer default num_layers=1

    key = jax.random.PRNGKey(0)
    kx, kp = jax.random.split(key)

    x = jax.random.normal(kx, (B, S, D), jnp.float32)
    mask = jnp.ones((B, S), jnp.float32).at[1, 6:].set(0.0)   # pad batch 1

    params = [prepare_block_params(init_block_params(k, D), HEADS)
              for k in jax.random.split(kp, NUM_LAYERS)]

    emb, cls_emb = transformer_layer_forward(x, mask, params, HEADS)
    jax.block_until_ready((emb, cls_emb))

    assert emb.shape == (B, S, D) and cls_emb.shape == (B, D)
    assert bool(jnp.all(jnp.isfinite(emb)))
    print("KERNEL_OK")
</pallas_src>

<mosaic_0001>
module attributes {stable_mosaic.version = 11 : i64} {
  func.func @qkv_kernel(%arg0: i32, %arg1: i32, %arg2: memref<1x8x32xf32, #tpu.memory_space<vmem>>, %arg3: memref<1x32xf32, #tpu.memory_space<vmem>>, %arg4: memref<1x32xf32, #tpu.memory_space<vmem>>, %arg5: memref<32x96xbf16, #tpu.memory_space<vmem>>, %arg6: memref<1x8x32xbf16, #tpu.memory_space<vmem>>, %arg7: memref<1x32x8xbf16, #tpu.memory_space<vmem>>, %arg8: memref<1x8x32xbf16, #tpu.memory_space<vmem>>) attributes {dimension_semantics = [#tpu.dimension_semantics<parallel>, #tpu.dimension_semantics<parallel>], iteration_bounds = array<i64: 2, 1>, scalar_prefetch = 0 : i64, scratch_operands = 0 : i64, tpu.core_type = #tpu.core_type<tc>, window_params = [{transform_indices = @transform_0, window_bounds = array<i64: 1, 8, 32>}, {pipeline_mode = #tpu.pipeline_mode<synchronous>, transform_indices = @transform_1, window_bounds = array<i64: 1, 32>}, {pipeline_mode = #tpu.pipeline_mode<synchronous>, transform_indices = @transform_2, window_bounds = array<i64: 1, 32>}, {pipeline_mode = #tpu.pipeline_mode<synchronous>, transform_indices = @transform_3, window_bounds = array<i64: 32, 96>}, {transform_indices = @transform_4, window_bounds = array<i64: 1, 8, 32>}, {transform_indices = @transform_5, window_bounds = array<i64: 1, 32, 8>}, {transform_indices = @transform_6, window_bounds = array<i64: 1, 8, 32>}]} {
    %c0 = arith.constant 0 : index
    %c0_0 = arith.constant 0 : index
    %c0_1 = arith.constant 0 : index
    %0 = vector.load %arg2[%c0, %c0_0, %c0_1] : memref<1x8x32xf32, #tpu.memory_space<vmem>>, vector<1x8x32xf32>
    %1 = vector.shape_cast %0 : vector<1x8x32xf32> to vector<8x32xf32>
    %c0_2 = arith.constant 0 : index
    %c0_3 = arith.constant 0 : index
    %2 = vector.load %arg3[%c0_2, %c0_3] : memref<1x32xf32, #tpu.memory_space<vmem>>, vector<1x32xf32>
    %c0_4 = arith.constant 0 : index
    %c0_5 = arith.constant 0 : index
    %3 = vector.load %arg4[%c0_4, %c0_5] : memref<1x32xf32, #tpu.memory_space<vmem>>, vector<1x32xf32>
    %cst = arith.constant dense<0.000000e+00> : vector<8xf32>
    %4 = vector.multi_reduction <add>, %1, %cst [1] : vector<8x32xf32> to vector<8xf32>
    %5 = vector.shape_cast %4 : vector<8xf32> to vector<8x1xf32>
    %cst_6 = arith.constant 3.200000e+01 : f32
    %6 = vector.broadcast %cst_6 : f32 to vector<8x1xf32>
    %7 = arith.divf %5, %6 : vector<8x1xf32>
    %8 = vector.broadcast %7 : vector<8x1xf32> to vector<8x32xf32>
    %9 = arith.subf %1, %8 : vector<8x32xf32>
    %10 = arith.mulf %9, %9 : vector<8x32xf32>
    %cst_7 = arith.constant dense<0.000000e+00> : vector<8xf32>
    %11 = vector.multi_reduction <add>, %10, %cst_7 [1] : vector<8x32xf32> to vector<8xf32>
    %12 = vector.shape_cast %11 : vector<8xf32> to vector<8x1xf32>
    %cst_8 = arith.constant 3.200000e+01 : f32
    %13 = vector.broadcast %cst_8 : f32 to vector<8x1xf32>
    %14 = arith.divf %12, %13 : vector<8x1xf32>
    %15 = vector.broadcast %7 : vector<8x1xf32> to vector<8x32xf32>
    %16 = arith.subf %1, %15 : vector<8x32xf32>
    %cst_9 = arith.constant 9.99999974E-6 : f32
    %17 = vector.broadcast %cst_9 : f32 to vector<8x1xf32>
    %18 = arith.addf %14, %17 : vector<8x1xf32>
    %19 = math.rsqrt %18 : vector<8x1xf32>
    %20 = vector.broadcast %19 : vector<8x1xf32> to vector<8x32xf32>
    %21 = arith.mulf %16, %20 : vector<8x32xf32>
    %22 = vector.broadcast %2 : vector<1x32xf32> to vector<8x32xf32>
    %23 = arith.mulf %21, %22 : vector<8x32xf32>
    %24 = vector.broadcast %3 : vector<1x32xf32> to vector<8x32xf32>
    %25 = arith.addf %23, %24 : vector<8x32xf32>
    %26 = arith.truncf %25 : vector<8x32xf32> to vector<8x32xbf16>
    %c0_10 = arith.constant 0 : index
    %c0_11 = arith.constant 0 : index
    %27 = vector.load %arg5[%c0_10, %c0_11] : memref<32x96xbf16, #tpu.memory_space<vmem>>, vector<32x96xbf16>
    %cst_12 = arith.constant dense<0.000000e+00> : vector<8x96xf32>
    %28 = tpu.matmul %26, %27, %cst_12 {dimension_numbers = #tpu.dot_dimension_numbers<[1], [0], [0], [1], [0, 0, 1, 1], [], []>} : vector<8x32xbf16>, vector<32x96xbf16>, vector<8x96xf32> -> vector<8x96xf32>
    %29 = vector.extract_strided_slice %28 {offsets = [0, 0], sizes = [8, 32], strides = [1, 1]} : vector<8x96xf32> to vector<8x32xf32>
    %30 = arith.truncf %29 : vector<8x32xf32> to vector<8x32xbf16>
    %c0_13 = arith.constant 0 : index
    %c0_14 = arith.constant 0 : index
    %c0_15 = arith.constant 0 : index
    %31 = vector.load %arg6[%c0_13, %c0_14, %c0_15] : memref<1x8x32xbf16, #tpu.memory_space<vmem>>, vector<1x8x32xbf16>
    %32 = vector.shape_cast %31 : vector<1x8x32xbf16> to vector<8x32xbf16>
    %33 = vector.shape_cast %30 : vector<8x32xbf16> to vector<1x8x32xbf16>
    tpu.vector_store %arg6[%c0_13, %c0_14, %c0_15], %33 {strides = array<i32>} : memref<1x8x32xbf16, #tpu.memory_space<vmem>>, vector<1x8x32xbf16>,
    %34 = vector.extract_strided_slice %28 {offsets = [0, 32], sizes = [8, 32], strides = [1, 1]} : vector<8x96xf32> to vector<8x32xf32>
    %35 = arith.truncf %34 : vector<8x32xf32> to vector<8x32xbf16>
    %36 = tpu.transpose %35, [1, 0] : vector<8x32xbf16> -> vector<32x8xbf16>
    %c0_16 = arith.constant 0 : index
    %c0_17 = arith.constant 0 : index
    %c0_18 = arith.constant 0 : index
    %37 = vector.load %arg7[%c0_16, %c0_17, %c0_18] : memref<1x32x8xbf16, #tpu.memory_space<vmem>>, vector<1x32x8xbf16>
    %38 = vector.shape_cast %37 : vector<1x32x8xbf16> to vector<32x8xbf16>
    %39 = vector.shape_cast %36 : vector<32x8xbf16> to vector<1x32x8xbf16>
    tpu.vector_store %arg7[%c0_16, %c0_17, %c0_18], %39 {strides = array<i32>} : memref<1x32x8xbf16, #tpu.memory_space<vmem>>, vector<1x32x8xbf16>,
    %40 = vector.extract_strided_slice %28 {offsets = [0, 64], sizes = [8, 32], strides = [1, 1]} : vector<8x96xf32> to vector<8x32xf32>
    %41 = arith.truncf %40 : vector<8x32xf32> to vector<8x32xbf16>
    %c0_19 = arith.constant 0 : index
    %c0_20 = arith.constant 0 : index
    %c0_21 = arith.constant 0 : index
    %42 = vector.load %arg8[%c0_19, %c0_20, %c0_21] : memref<1x8x32xbf16, #tpu.memory_space<vmem>>, vector<1x8x32xbf16>
    %43 = vector.shape_cast %42 : vector<1x8x32xbf16> to vector<8x32xbf16>
    %44 = vector.shape_cast %41 : vector<8x32xbf16> to vector<1x8x32xbf16>
    tpu.vector_store %arg8[%c0_19, %c0_20, %c0_21], %44 {strides = array<i32>} : memref<1x8x32xbf16, #tpu.memory_space<vmem>>, vector<1x8x32xbf16>,
    return
  }
  func.func @transform_0(%arg0: i32, %arg1: i32) -> (i32, i32, i32) {
    %c0_i32 = arith.constant 0 : i32
    %c0_i32_0 = arith.constant 0 : i32
    return %arg0, %arg1, %c0_i32 : i32, i32, i32
  }
  func.func @transform_1(%arg0: i32, %arg1: i32) -> (i32, i32) {
    %c0_i32 = arith.constant 0 : i32
    %c0_i32_0 = arith.constant 0 : i32
    %c0_i32_1 = arith.constant 0 : i32
    return %c0_i32, %c0_i32_0 : i32, i32
  }
  func.func @transform_2(%arg0: i32, %arg1: i32) -> (i32, i32) {
    %c0_i32 = arith.constant 0 : i32
    %c0_i32_0 = arith.constant 0 : i32
    %c0_i32_1 = arith.constant 0 : i32
    return %c0_i32, %c0_i32_0 : i32, i32
  }
  func.func @transform_3(%arg0: i32, %arg1: i32) -> (i32, i32) {
    %c0_i32 = arith.constant 0 : i32
    %c0_i32_0 = arith.constant 0 : i32
    %c0_i32_1 = arith.constant 0 : i32
    return %c0_i32, %c0_i32_0 : i32, i32
  }
  func.func @transform_4(%arg0: i32, %arg1: i32) -> (i32, i32, i32) {
    %c0_i32 = arith.constant 0 : i32
    %c0_i32_0 = arith.constant 0 : i32
    return %arg0, %arg1, %c0_i32 : i32, i32, i32
  }
  func.func @transform_5(%arg0: i32, %arg1: i32) -> (i32, i32, i32) {
    %c0_i32 = arith.constant 0 : i32
    %c0_i32_0 = arith.constant 0 : i32
    return %arg0, %c0_i32, %arg1 : i32, i32, i32
  }
  func.func @transform_6(%arg0: i32, %arg1: i32) -> (i32, i32, i32) {
    %c0_i32 = arith.constant 0 : i32
    %c0_i32_0 = arith.constant 0 : i32
    return %arg0, %arg1, %c0_i32 : i32, i32, i32
  }
}

</mosaic_0001>

<bundles_post_ra>
// kernel: tpu_custom_call.1
= control target key start
LH: loop header
LB: loop body
LE: loop exit
PB: predicated region body
PF: predicated region fallthrough
CT: control target
= control target key end

     0   :  { %s1246_s0 = inlined_call_operand.hbm [shape: f32[2,8,32], index: 0, kind: input, shape index: {}]   ;;  %s1247_s1 = inlined_call_operand.hbm [shape: f32[1,32], index: 1, kind: input, shape index: {}]   ;;  %s1248_s2 = inlined_call_operand.vmem [shape: f32[1,32], index: 2, kind: input, shape index: {}]   ;;  %s1249_s3 = inlined_call_operand.hbm [shape: bf16[32,96], index: 3, kind: input, shape index: {}]   ;;  %s1250_s4 = inlined_call_operand.hbm [shape: bf16[2,8,32], index: 4, kind: output, shape index: {0}]   ;;  %s1251_s5 = inlined_call_operand.vmem [shape: bf16[2,32,8], index: 5, kind: output, shape index: {1}]   ;;  %s1252_s6 = inlined_call_operand.hbm [shape: bf16[2,8,32], index: 6, kind: output, shape index: {2}]  }
   0x1   :  { %1253 = sst [smem:[#allocation15_spill]] %s1246_s0 }
   0x2   :  { %1254 = sst [smem:[#allocation16_spill]] %s1247_s1 }
   0x3   :  { %1255 = sst [smem:[#allocation17_spill]] %s1248_s2 }
   0x4   :  { %1256 = sst [smem:[#allocation18_spill]] %s1249_s3 }
   0x5   :  { %12 = vsyncpa [#allocation3], 0 }
   0x6   :  { %14 = vsyncpa [#allocation3 + $0x1], 0 }
   0x7   :  { %15 = vsyncpa [#allocation6], 0 }
   0x8   :  { %16 = vsyncpa [#allocation4], 0 }
   0x9   :  { %18 = vsyncpa [#allocation4 + $0x1], 0 }
   0xa   :  { %19 = vsyncpa [#allocation10], 0 }
   0xb   :  { %21 = vsyncpa [#allocation10 + $0x1], 0  ;;  %s1074_s21 = smov 0   ;;  %s1076_s22 = smov 0  }
   0xc   :  { %s1078_s23 = smov 0   ;;  %s1080_s24 = smov 0  }
   0xd   :  { %s1082_s25 = smov 0   ;;  %s1084_s26 = smov 0  }
   0xe LB: > { %s688_s27 = sadd.s32 4294967295, %s1030_s26   ;;  %s689_s28 = sadd.s32 4294967294, %s1030_s26   ;;  %s1030_s26 = sphi %s1084_s26, %s27_s26   ;;  %s1026_s25 = sphi %s1082_s25, %s1270_s25   ;;  %s1022_s24 = sphi %s1080_s24, %s1269_s24   ;;  %s1018_s23 = sphi %s1078_s23, %s1268_s23   ;;  %s1014_s22 = sphi %s1076_s22, %s1267_s22   ;;  %s1010_s21 = sphi %s1074_s21, %s1266_s21  }
   0xf   : > { %p61_p0 = scmp.ne.s32.totalorder %s1014_s22, %s1010_s21  ;;  %p1110_p1 = scmp.eq.s32.totalorder %s688_s27, 0 }
  0x10   : > { %p156_p2 = scmp.eq.s32.totalorder %s689_s28, 1  ;;  %p690_p4 = scmp.ge.s32.totalorder %s1030_s26, 1 }
  0x11   : > { %p1116_p3 = por %p1110_p1, %p61_p0  ;;  %p219_p6 = scmp.lt.s32.totalorder %s1030_s26, 3 }
  0x12   : > { %p1121_p5 = por %p156_p2, %p61_p0  ;;  %s1260_s1 = sld [smem:[#allocation16_spill]] }
  0x13   : > { %p1129_p7 = pnand %p690_p4, %p219_p6  ;;  %p693_p8 = scmp.ge.s32.totalorder %s1030_s26, 2 }
  0x14   : > { %s1032_s12 = smov [#allocation5]   ;;  %s1262_s3 = sld [smem:[#allocation18_spill]] }
  0x15   : > { %p736_p9 = pneg %p1129_p7  ;;  %s233_s13 = sshll.u32 %s1032_s12, 4  ;;  %s234_s13 = int_to_ptr.vmem [resolvable:$true] %s233_s13 }
  0x16   : > { %s1033_s17 = smov [#allocation7]   ;;  %s1034_s19 = smov 64  }
  0x17   : > { %p737_p10 = pnand %p736_p9, %p1110_p1  ;;  %s247_s18 = sshll.u32 %s1033_s17, 4  ;;  %s248_s18 = int_to_ptr.vmem [resolvable:$true] %s247_s18 }
  0x18   : > { %s231_s10 = sshll.u32 %s1260_s1, 4  ;;  %s1035_s20 = smov 4   ;;  %s232_s10 = int_to_ptr.hbm [resolvable:$true] %s231_s10 }
  0x19   : > { %739 = dma.hbm_to_vmem [thread:$0]  (!%p737_p10), %s232_s10, 16, %s234_s13, [#allocation6]  }
  0x1a   : > { %s245_s16 = sshll.u32 %s1262_s3, 4  ;;  %p150_p11 = scmp.eq.s32.totalorder %s688_s27, 1  ;;  %s246_s16 = int_to_ptr.hbm [resolvable:$true] %s245_s16 }
  0x1b   : > { %742 = dma.hbm_to_vmem [thread:$0]  (!%p737_p10), %s246_s16, 256, %s248_s18, [#allocation6], %s1034_s19, %s1034_s19, %s1035_s20  }
  0x1c   : > { %s39_s28 = sadd.s32 1, %s1026_s25  ;;  %s48_s8 = sadd.s32 1, %s1018_s23 }
  0x1d   : > { %p41_p12 = scmp.ge.s32.totalorder %s39_s28, 2  ;;  %p55_p13 = scmp.ne.s32.totalorder %s1018_s23, %s1014_s22 }
  0x1e   : > { %p56_p0 = scmp.eq.s32.totalorder %s1030_s26, 0  ;;  %p756_p4 = scmp.lt.s32.totalorder %s1030_s26, 2 }
  0x1f   : > { %s1272_s28 = smov (%p41_p12, %s39_s28), 0  ;;  %p1150_p2 = por %p150_p11, %p55_p13 }
  0x20   : > { %s43_s10 = ssub.s32 %s1026_s25, %s1272_s28  ;;  %s261_s12 = sand.u32 1, %s1018_s23  }
  0x21   : > { %p46_p6 = scmp.eq.s32.totalorder %s43_s10, 0  ;;  %p57_p9 = por %p56_p0, %p55_p13 }
  0x22   : > { %s694_s13 = sshll.u32 %s261_s12, 3  ;;  %s695_s27 = sshll.u32 %s1026_s25, 3 }
  0x23   : > { %s1160_s14 = scalar_select %p46_p6, %s1018_s23, %s48_s8  }
  0x24   : > { %s1264_s0 = sld [smem:[#allocation15_spill]]  ;;  %s265_s19 = scalar_lea.vmem [#allocation2], %s694_s13 }
  0x25   : > { %s274_s20 = sshll.u32 %s265_s19, 4  ;;  %p744_p10 = pnand %p756_p4, %p57_p9  ;;  %s275_s20 = int_to_ptr.vmem [resolvable:$true] %s274_s20 }
  0x26   : > { %s262_s1 = scalar_lea.sflag [#allocation3], %s261_s12  ;;  %s1170_s8 = sand.u32 (!%p1129_p7), 1, %s1014_s22  }
  0x27   : > { %s697_s10 = sshll.u32 (!%p1129_p7), %s1170_s8, 3 }
  0x28   : > { %283 = sbr.rel (%p1129_p7) target bundleno = 757 (0x2f5), region = 36  ;;  %s289_s15 = scalar_lea.vmem (!%p1129_p7), [#allocation2], %s697_s10 }
  0x2a   : > { %s270_s17 = scalar_lea.hbm %s1264_s0, %s695_s27  ;;  %s286_s27 = scalar_lea.sflag (!%p1129_p7), [#allocation3], %s1170_s8 }
  0x2b   : > { %s272_s18 = sshll.u32 %s270_s17, 4  ;;  %s273_s18 = int_to_ptr.hbm [resolvable:$true] %s272_s18 }
  0x2c   : > { %746 = dma.hbm_to_vmem [thread:$0]  (!%p744_p10), %s273_s18, 128, %s275_s20, %s262_s1  }
  0x2d   : > { %993 = dma.done.wait (%p1116_p3), %s286_s27, 128  }
  0x2e   : > { %995 = vsyncadd (%p1116_p3), %s286_s27, 4294967168 }
  0x2f   : > { %997 = dma.done.wait (%p1110_p1), [#allocation6], 272  }
  0x30   : > { %999 = vsyncadd (%p1110_p1), [#allocation6], 4294967024  ;;  %vm354_vm0 = vcmask 261120   ;;  %v351_v0 = vld [vmem:[%s289_s15] sm:$0xff]  ;;  %v1036_v2 = vmov 32.0   ;;  %v720_v15 = vld [vmem:[#allocation7] sm:$0xff] }
  0x31   : > { %v355_v1 = vsel %vm354_vm0, %v351_v0, 0.0  ;;  %818 = vrcp.f32 %v1036_v2  ;;  %v721_v14 = vld [vmem:[#allocation7 + $0x8] sm:$0xff]  ;;  %v816_v25 = vld [vmem:[#allocation5] ss:$0 sm:$0xff]  ;;  %s1265_s2 = sld [smem:[#allocation17_spill]]  ;;  %s700_s30 = sshll.u32 %s1170_s8, 2 }
  0x32   : > { %356 = vadd.xlane.f32.xlu0 %v355_v1  ;;  %418 = vmatpush.bf16.msra.mxu0 %v721_v14  ;;  %vm426_vm5 = vcmask 257024   ;;  %s1037_s11 = smov 64   ;;  %s1038_s12 = smov 96  }
  0x33   : > { %s324_s13 = scalar_lea.vmem [#allocation8], %s700_s30  ;;  %s341_s16 = scalar_lea.vmem [#allocation9], %s700_s30 }
  0x34   : > { %s715_s17 = sshll.u32 %s1022_s24, 2  ;;  %s498_s1 = sshll.u32 %s324_s13, 4  ;;  %s499_s1 = int_to_ptr.vmem [resolvable:$true] %s498_s1 }
  0x35   : > { %s496_s20 = scalar_lea.hbm %s1250_s4, %s715_s17  ;;  %s514_s15 = scalar_lea.hbm %s1252_s6, %s715_s17 }
  0x36   : > { %419 = vmatpush.bf16.msra.mxu0 %v720_v15  ;;  %s500_s29 = sshll.u32 %s496_s20, 4  ;;  %s932_s18 = scalar_lea.hbm %s1250_s4, 8  ;;  %s501_s29 = int_to_ptr.hbm [resolvable:$true] %s500_s29 }
  0x37   : > { %v819_v3 = vpop.eup %818  ;;  %v817_v28 = vld [vmem:[%s1265_s2] ss:$0 sm:$0xff] }
  0x38   : > { %v359_v4 = vmul.f32 32.0, %v819_v3  ;;  %vm363_vm1 = vweird.f32 %v819_v3 }
  0x3a   : > { %v360_v5 = vsub.f32 1.0, %v359_v4 }
  0x3c   : > { %v361_v6 = vmul.f32 %v819_v3, %v360_v5 }
  0x3e   : > { %v362_v7 = vadd.f32 %v819_v3, %v361_v6 }
  0x40   : > { %v364_v8 = vsel %vm363_vm1, %v819_v3, %v362_v7 }
  0xa5   : > { %v357_v9 = vpop.xlane.xlu0 %356 }
  0xa6   : > { %v365_v10 = vmul.f32 %v364_v8, %v357_v9 }
  0xa8   : > { %v366_v11 = vsub.f32 %v351_v0, %v365_v10 }
  0xaa   : > { %v367_v12 = vmul.f32 %v366_v11, %v366_v11 }
  0xac   : > { %v368_v13 = vsel %vm354_vm0, %v367_v12, 0.0 }
  0xad   : > { %369 = vadd.xlane.f32.xlu0 %v368_v13 }
 0x120   : > { %v370_v16 = vpop.xlane.xlu0 %369 }
 0x121   : > { %v371_v17 = vmul.f32 %v370_v16, %v364_v8 }
 0x123   : > { %v372_v18 = vadd.f32 1e-05, %v371_v17 }
 0x125   : > { %820 = vrsqrt.f32 %v372_v18  ;;  %vm379_vm3 = vweird.f32 %v372_v18 }
 0x12b   : > { %v821_v19 = vpop.eup %820 }
 0x12c   : > { %v374_v20 = vmul.f32 %v821_v19, %v372_v18  ;;  %vm380_vm2 = vweird.f32 %v821_v19 }
 0x12d   : > { %vm381_vm4 = vmor %vm379_vm3, %vm380_vm2 }
 0x12e   : > { %v375_v21 = vmul.f32 %v821_v19, %v374_v20 }
 0x130   : > { %v376_v22 = vmul.f32 0.5, %v375_v21 }
 0x132   : > { %v377_v23 = vsub.f32 1.5, %v376_v22 }
 0x134   : > { %v378_v24 = vmul.f32 %v821_v19, %v377_v23 }
 0x136   : > { %v382_v26 = vsel %vm381_vm4, %v821_v19, %v378_v24 }
 0x137   : > { %v383_v27 = vmul.f32 %v382_v26, %v366_v11 }
 0x139   : > { %v387_v29 = vmul.f32 %v816_v25, %v383_v27 }
 0x13b   : > { %v391_v30 = vadd.f32 %v817_v28, %v387_v29 }
 0x13d   : > { %v392_v31 = vpack.c.bf16 %v391_v30, %v391_v30 }
 0x13f   : > { %712 = vmatmul.msk.bf16.vlgmr.msra.gmra.mxu0 %vm354_vm0, %v392_v31 }
 0x1bc   : > { %v421_v32 = vpop.f32.mrf.mxu0 }
 0x1bd   : > { %v425_v33 = vpack.c.bf16 %v421_v32, %v421_v32 }
 0x1bf   : > { %467 = vrot.lane.b32.xlu2 %v425_v33, %s1037_s11  ;;  %429 = vrot.lane.b32.xlu1 %v425_v33, %s1038_s12  ;;  %427 = vst.msk [vmem:[%s324_s13] sm:$0xf] %vm426_vm5, %v425_v33  ;;  %s472_s11 = scalar_lea.sflag [#allocation4], %s1170_s8  ;;  %s926_s12 = sshra.s32 %s501_s29, 4  ;;  %s927_s12 = int_to_ptr.hbm [resolvable:$true] %s926_s12 }
 0x1c0   : > { %s928_s30 = scalar_lea.hbm %s927_s12, 4  ;;  %p933_p11 = scmp.lt.s32.totalorder %s927_s12, %s1250_s4 }
 0x1c1   : > { %p929_p1 = scmp.ne.s32.totalorder %s927_s12, %s928_s30  ;;  %p934_p12 = scmp.lt.s32.totalorder %s932_s18, %s928_s30 }
 0x1c3   : > { %p930_p3 = pnand %p929_p1, %p1150_p2  ;;  %p935_p13 = por %p934_p12, %p933_p11 }
 0x1c4   : > { %v423_v34 = vpop.f32.mrf.mxu0 }
 0x1c5   : > { %p931_p7 = pneg %p930_p3 }
 0x1c7   : > { %p936_p0 = pnand %p935_p13, %p931_p7 }
 0x219   : > { %v468_v35 = vpop.permute.xlu2 %467 }
 0x21a   : > { %470 = vst.msk [vmem:[%s341_s16] sm:$0xf] %vm426_vm5, %v468_v35 }
 0x231   : > { %v430_v36 = vpop.permute.xlu1 %429 }
 0x232   : > { %432 = vxpose.xlu1.c.b16.start.end [1/1] (short) (narrow) %v430_v36, 32 }
 0x233   : > { %939 = shalt.err (!%p936_p0)
}
 0x234   : > { %732 = dma.vmem_to_hbm [thread:$0]  (%p1150_p2), %s499_s1, 64, %s501_s29, %s472_s11  }
 0x235   : > { %s516_s13 = sshll.u32 %s341_s16, 4  ;;  %s518_s17 = sshll.u32 %s514_s15, 4  ;;  %s517_s13 = int_to_ptr.vmem [resolvable:$true] %s516_s13  ;;  %s519_s17 = int_to_ptr.hbm [resolvable:$true] %s518_s17 }
 0x236   : > { %s485_s20 = scalar_lea.sflag [#allocation10], %s1170_s8  ;;  %s954_s0 = sshra.s32 %s519_s17, 4  ;;  %s955_s0 = int_to_ptr.hbm [resolvable:$true] %s954_s0 }
 0x237   : > { %s956_s2 = scalar_lea.hbm %s955_s0, 4  ;;  %s960_s27 = scalar_lea.hbm %s1252_s6, 8 }
 0x238   : > { %p957_p4 = scmp.ne.s32.totalorder %s955_s0, %s956_s2  ;;  %p961_p10 = scmp.lt.s32.totalorder %s955_s0, %s1252_s6 }
 0x239   : > { %p962_p1 = scmp.lt.s32.totalorder %s960_s27, %s956_s2 }
 0x23a   : > { %p958_p6 = pnand %p957_p4, %p1150_p2 }
 0x23b   : > { %p963_p3 = por %p962_p1, %p961_p10 }
 0x23c   : > { %p959_p9 = pneg %p958_p6 }
 0x23e   : > { %p964_p7 = pnand %p963_p3, %p959_p9 }
 0x240   : > { %967 = shalt.err (!%p964_p7)
}
 0x241   : > { %733 = dma.vmem_to_hbm [thread:$0]  (%p1150_p2), %s517_s13, 64, %s519_s17, %s485_s20   ;;  %vm462_vm6 = vcmask 60416  }
 0x242   : > { %p342_p11 = scmp.lt.s32.totalorder %s1022_s24, 1 }
 0x244   : > { %s1274_s24 = smov (!%p342_p11, %s1022_s24), 1 }
 0x245   : > { %s719_s8 = sshll.u32 %s1274_s24, 4 }
 0x246   : > { %s349_s1 = scalar_lea.vmem %s1251_s5, %s719_s8 }
 0x2de   : > { %v440_v37 = vpop.trf.xlu1 }
 0x2df   : > { %v450_v38 = vunpack.c.l.b16 %v440_v37  ;;  %v451_v39 = vunpack.c.h.b16 %v440_v37 }
 0x2e1   : > { %v454_v40 = vpack.c.b16 %v450_v38, %v450_v38  ;;  %v455_v41 = vpack.c.b16 %v451_v39, %v451_v39 }
 0x2e3   : > { %463 = vst.msk [vmem:[%s349_s1] sm:$0xf] %vm462_vm6, %v454_v40 }
 0x2e4   : > { %464 = vst.msk [vmem:[%s349_s1 + $0x4] sm:$0xf] %vm462_vm6, %v455_v41 }
 0x2ee   : > { %v441_v42 = vpop.trf.xlu1 }
 0x2ef   : > { %v452_v43 = vunpack.c.l.b16 %v441_v42  ;;  %v453_v44 = vunpack.c.h.b16 %v441_v42 }
 0x2f1   : > { %v456_v45 = vpack.c.b16 %v452_v43, %v452_v43  ;;  %v457_v46 = vpack.c.b16 %v453_v44, %v453_v44 }
 0x2f3   : > { %465 = vst.msk [vmem:[%s349_s1 + $0x8] sm:$0xf] %vm462_vm6, %v456_v45 }
 0x2f4   : > { %466 = vst.msk [vmem:[%s349_s1 + $0xc] sm:$0xf] %vm462_vm6, %v457_v46 }
 0x2f5 PF: > { %s530_s24 = sand.u32 1, %s1010_s21   ;;  %p748_p2 = pnand %p693_p8, %p1121_p5 }
 0x2f6   : > { %s531_s9 = scalar_lea.sflag [#allocation4], %s530_s24 }
 0x2f7   : > { %p749_p12 = pneg %p748_p2 }
 0x2f9   : > { %1001 = dma.done.wait (%p749_p12), %s531_s9, 64  }
 0x2fa   : > { %1003 = vsyncadd (%p749_p12), %s531_s9, 4294967232  ;;  %s552_s29 = scalar_lea.sflag [#allocation10], %s530_s24 }
 0x2fb   : > { %1005 = dma.done.wait (%p749_p12), %s552_s29, 64  }
 0x2fc   : > { %1007 = vsyncadd (%p749_p12), %s552_s29, 4294967232  ;;  %s27_s26 = sadd.s32 1, %s1030_s26   ;;  %s1266_s21 = smov %s1014_s22 }
 0x2fd   : > { %p24_p13 = scmp.ge.s32.totalorder %s27_s26, 4   ;;  %s1267_s22 = smov %s1018_s23 }
 0x2fe   : > { %s1268_s23 = smov %s1160_s14  ;;  %s1269_s24 = smov %s1026_s25 }
 0x2ff   : > { %s1270_s25 = smov %s1272_s28  ;;  %26 = sbr.rel (!%p24_p13) target bundleno = 14 (0xe), region = 118 }
 0x304   :  { %558 = vsyncpa [#allocation3], 1 }
 0x305   :  { %560 = vsyncpa [#allocation3 + $0x1], 1 }
 0x306   :  { %561 = vsyncpa [#allocation6], 1 }
 0x307   :  { %562 = vsyncpa [#allocation4], 1 }
 0x308   :  { %564 = vsyncpa [#allocation4 + $0x1], 1 }
 0x309   :  { %565 = vsyncpa [#allocation10], 1 }
 0x30a   :  { %567 = vsyncpa [#allocation10 + $0x1], 1 }

</bundles_post_ra>
